<compile_context>
chip_gen: v5e
topology: v5e:2x2
jax: 0.10.0
libtpu: 0.0.40
codegen_flags: <defaults>
</compile_context>

<pallas_src>
import functools

import jax
import jax.numpy as jnp
from jax.experimental import pallas as pl
from jax.experimental.pallas import tpu as pltpu


def _round_up(x, m):
    return ((x + m - 1) // m) * m


def _largest_div_tile(padded_dim, target, align):
    """Largest multiple of `align` that divides `padded_dim` and is <= target."""
    t = (min(target, padded_dim) // align) * align
    while t > align:
        if padded_dim % t == 0:
            return t
        t -= align
    return align


def _pick_tm(batch, target, align=8, max_waste=0.10):
    """Row tile: largest multiple of 8 <= target that keeps M-padding waste small."""
    b_al = _round_up(batch, align)
    if b_al <= target:
        return b_al
    t = (target // align) * align
    best_t, best_pad = t, _round_up(batch, t) - batch
    while t >= align:
        pad = _round_up(batch, t) - batch
        if pad <= max_waste * batch:
            return t
        if pad < best_pad:
            best_t, best_pad = t, pad
        t -= align
    return best_t


def _vmem_limit_bytes():
    # ~75% of physical VMEM: ~96 MiB on v5e/v6e (128 MiB), ~48 MiB on v7x (64 MiB).
    try:
        info = pltpu.get_tpu_info()
        phys = getattr(info, "vmem_capacity_bytes", None)
        if phys:
            return (int(phys) * 3) // 4
    except Exception:
        pass
    return 48 << 20  # safe on every generation if the query is unavailable


def _vmem_estimate(tm, tn, tk, c_bytes, o_bytes, wbuf):
    return (2 * tm * tk * c_bytes        # x double buffer
            + wbuf * tk * tn * c_bytes   # weight buffers
            + 2 * tm * tn * o_bytes      # output double buffer
            + tm * tn * 4                # f32 accumulator
            + 2 * tn * 4)                # bias


def _mlp_kernel(x_ref, w_ref, b_ref, o_ref, acc_ref, *, act):
    # x_ref: (tm, tk)  w_ref: (tk, tn)  b_ref: (1, tn) f32  o_ref: (tm, tn)  acc_ref: (tm, tn) f32
    k = pl.program_id(2)
    prod = jnp.dot(x_ref[...], w_ref[...], preferred_element_type=jnp.float32)

    @pl.when(k == 0)
    def _():
        acc_ref[...] = prod          # write directly: no zero-init pass

    @pl.when(k > 0)
    def _():
        acc_ref[...] += prod

    @pl.when(k == pl.num_programs(2) - 1)
    def _():
        y = acc_ref[...] + b_ref[...].astype(jnp.float32)   # bias only in epilogue (f32 VPU math)
        if act:
            y = jnp.maximum(y, 0.0)                          # ReLU (ACT)
        o_ref[...] = y.astype(o_ref.dtype)


def prepare_mlp_params(weight, bias=None, *, compute_dtype=jnp.bfloat16):
    """One-time parameter prep (call at init, NOT per forward):
    transpose [Dout, Din] -> [Din, Dout], cast MXU operand dtype, pad to 128 multiples."""
    Dout, Din = weight.shape
    K_pad = _round_up(Din, 128)
    N_pad = _round_up(Dout, 128)
    w_t = weight.T
    if compute_dtype is not None and w_t.dtype != compute_dtype:
        w_t = w_t.astype(compute_dtype)
    w_p = jnp.pad(w_t, ((0, K_pad - Din), (0, N_pad - Dout)))
    if bias is None:
        # Zero bias keeps a single kernel path; the add rides free on the VPU in the epilogue.
        b_p = jnp.zeros((1, N_pad), dtype=jnp.float32)
    else:
        b_p = jnp.pad(bias.reshape(1, Dout).astype(jnp.float32),
                      ((0, 0), (0, N_pad - Dout)))
    return {"w": w_p, "b": b_p, "dim_in": Din, "dim_out": Dout}


def mlp_layer(x, params, act=True, *, tm_target=512, tn_target=512, tk_target=2048,
              interpret=False):
    """Forward pass of MLPLayer (bn=False): act(x @ W^T + b) with pre-prepared params."""
    w_p, b_p = params["w"], params["b"]
    Din, Dout = params["dim_in"], params["dim_out"]
    K_pad, N_pad = w_p.shape

    B, Din_x = x.shape
    assert Din_x == Din
    out_dtype = x.dtype
    c_dtype = w_p.dtype
    c_bytes = jnp.dtype(c_dtype).itemsize
    o_bytes = jnp.dtype(out_dtype).itemsize

    # ---- tile selection (multiples of (8, 128); N/K tiles divide the padded dims) ----
    tm = _pick_tm(B, tm_target)
    if tm <= 64:
        # Small batch: pure weight-streaming regime -> widen N tile so each grid step
        # moves a large, lane-dense weight slab and the per-step overhead is amortized.
        tn_target = max(tn_target, 2048)
    tn = _largest_div_tile(N_pad, tn_target, 128)
    tk = _largest_div_tile(K_pad, tk_target, 128)

    vmem_limit = _vmem_limit_bytes()
    budget = int(vmem_limit * 0.8)
    while _vmem_estimate(tm, tn, tk, c_bytes, o_bytes, 2) > budget and tk > 128:
        tk = _largest_div_tile(K_pad, max(tk // 2, 128), 128)
    while _vmem_estimate(tm, tn, tk, c_bytes, o_bytes, 2) > budget and tn > 128:
        tn = _largest_div_tile(N_pad, max(tn // 2, 128), 128)
    while _vmem_estimate(tm, tn, tk, c_bytes, o_bytes, 2) > budget and tm > 8:
        tm = max(8, _round_up(tm // 2, 8))

    M_pad = _round_up(B, tm)

    # ---- ensure >=2 parallel output blocks when possible (v7x megacore) ----
    if (M_pad // tm) * (N_pad // tn) < 2:
        if N_pad // 128 >= 2:
            tn = _largest_div_tile(N_pad, N_pad // 2, 128)
        elif _round_up(B, 8) >= 16:
            tm = _round_up(M_pad // 2, 8)
            M_pad = _round_up(B, tm)

    grid = (M_pad // tm, N_pad // tn, K_pad // tk)

    # Triple-buffer the weight stream only when the K loop is long and VMEM allows.
    wbuf = 2
    if K_pad // tk >= 3 and _vmem_estimate(tm, tn, tk, c_bytes, o_bytes, 3) <= budget:
        wbuf = 3
    w_spec_kwargs = {} if wbuf == 2 else dict(pipeline_mode=pl.Buffered(wbuf))

    # ---- activation prep (cast to MXU operand dtype, pad rows/cols) ----
    x_c = x.astype(c_dtype) if x.dtype != c_dtype else x
    x_p = jnp.pad(x_c, ((0, M_pad - B), (0, K_pad - Din)))

    cost = pl.CostEstimate(
        flops=2 * M_pad * K_pad * N_pad,
        transcendentals=0,
        bytes_accessed=(M_pad * K_pad * c_bytes) * (N_pad // tn)   # x re-read per N tile
        + (K_pad * N_pad * c_bytes) * (M_pad // tm)                # W re-read per M tile
        + (N_pad * 4) * (M_pad // tm)                              # bias
        + M_pad * N_pad * o_bytes,                                 # output
    )

    out_p = pl.pallas_call(
        functools.partial(_mlp_kernel, act=act),
        out_shape=jax.ShapeDtypeStruct((M_pad, N_pad), out_dtype),
        grid_spec=pltpu.PrefetchScalarGridSpec(
            num_scalar_prefetch=0,
            grid=grid,
            in_specs=[
                pl.BlockSpec((tm, tk), lambda i, j, k: (i, k)),                 # x tile
                pl.BlockSpec((tk, tn), lambda i, j, k: (k, j), **w_spec_kwargs),  # W^T tile
                pl.BlockSpec((1, tn), lambda i, j, k: (0, j)),                  # bias tile
            ],
            out_specs=pl.BlockSpec((tm, tn), lambda i, j, k: (i, j)),
            scratch_shapes=[pltpu.VMEM((tm, tn), jnp.float32)],                 # f32 accumulator
        ),
        compiler_params=pltpu.CompilerParams(
            dimension_semantics=("parallel", "parallel", "arbitrary"),
            vmem_limit_bytes=vmem_limit,
        ),
        cost_estimate=cost,
        interpret=interpret,
    )(x_p, w_p, b_p)

    return out_p[:B, :Dout]


if __name__ == "__main__":
    # Small shapes consistent with the module's forward: a plain MLP layer.
    batch, dim_in, dim_out = 8, 32, 32

    key = jax.random.PRNGKey(0)
    kx, kw, kb = jax.random.split(key, 3)

    # Deterministic parameter init (PyTorch Linear default: U(-1/sqrt(dim_in), 1/sqrt(dim_in)))
    bound = 1.0 / (dim_in ** 0.5)
    weight = jax.random.uniform(kw, (dim_out, dim_in), jnp.float32, -bound, bound)
    bias = jax.random.uniform(kb, (dim_out,), jnp.float32, -bound, bound)
    x = jax.random.normal(kx, (batch, dim_in), jnp.float32)

    params = prepare_mlp_params(weight, bias)   # one-time prep (transpose/cast/pad hoisted)
    out = mlp_layer(x, params, act=True)
    out = jax.block_until_ready(out)

    # References: same bf16-operand / f32-accumulation numerics, plus a loose f32 check.
    ref_bf16 = jnp.maximum(
        jnp.dot(x.astype(jnp.bfloat16), weight.T.astype(jnp.bfloat16),
                preferred_element_type=jnp.float32) + bias, 0.0)
    ref_f32 = jnp.maximum(x @ weight.T + bias, 0.0)

    assert out.shape == (batch, dim_out)
    assert out.dtype == x.dtype
    assert jnp.allclose(out, ref_bf16, atol=1e-3, rtol=1e-3)
    assert jnp.allclose(out, ref_f32, atol=5e-2, rtol=5e-2)

    print("KERNEL_OK")
</pallas_src>

<mosaic_0001>
module attributes {stable_mosaic.version = 11 : i64} {
  func.func @_mlp_kernel(%arg0: i32, %arg1: i32, %arg2: i32, %arg3: memref<8x128xbf16, #tpu.memory_space<vmem>>, %arg4: memref<128x128xbf16, #tpu.memory_space<vmem>>, %arg5: memref<1x128xf32, #tpu.memory_space<vmem>>, %arg6: memref<8x128xf32, #tpu.memory_space<vmem>>, %arg7: memref<8x128xf32, #tpu.memory_space<vmem>>) attributes {dimension_semantics = [#tpu.dimension_semantics<parallel>, #tpu.dimension_semantics<parallel>, #tpu.dimension_semantics<arbitrary>], iteration_bounds = array<i64: 1, 1, 1>, scalar_prefetch = 0 : i64, scratch_operands = 1 : i64, tpu.core_type = #tpu.core_type<tc>, window_params = [{transform_indices = @transform_0, window_bounds = array<i64: 8, 128>}, {transform_indices = @transform_1, window_bounds = array<i64: 128, 128>}, {transform_indices = @transform_2, window_bounds = array<i64: 1, 128>}, {transform_indices = @transform_3, window_bounds = array<i64: 8, 128>}]} {
    %c0 = arith.constant 0 : index
    %c0_0 = arith.constant 0 : index
    %0 = vector.load %arg3[%c0, %c0_0] : memref<8x128xbf16, #tpu.memory_space<vmem>>, vector<8x128xbf16>
    %c0_1 = arith.constant 0 : index
    %c0_2 = arith.constant 0 : index
    %1 = vector.load %arg4[%c0_1, %c0_2] : memref<128x128xbf16, #tpu.memory_space<vmem>>, vector<128x128xbf16>
    %cst = arith.constant dense<0.000000e+00> : vector<8x128xf32>
    %2 = tpu.matmul %0, %1, %cst {dimension_numbers = #tpu.dot_dimension_numbers<[1], [0], [0], [1], [0, 0, 1, 1], [], []>} : vector<8x128xbf16>, vector<128x128xbf16>, vector<8x128xf32> -> vector<8x128xf32>
    %c0_i32 = arith.constant 0 : i32
    %3 = arith.cmpi eq, %arg2, %c0_i32 : i32
    %4 = arith.extui %3 : i1 to i32
    %c0_i32_3 = arith.constant 0 : i32
    %5 = arith.cmpi ne, %4, %c0_i32_3 : i32
    scf.if %5 {
      %c0_8 = arith.constant 0 : index
      %c0_9 = arith.constant 0 : index
      %12 = vector.load %arg7[%c0_8, %c0_9] : memref<8x128xf32, #tpu.memory_space<vmem>>, vector<8x128xf32>
      tpu.vector_store %arg7[%c0_8, %c0_9], %2 {strides = array<i32>} : memref<8x128xf32, #tpu.memory_space<vmem>>, vector<8x128xf32>,
    } else {
    }
    %c0_i32_4 = arith.constant 0 : i32
    %6 = arith.cmpi sgt, %arg2, %c0_i32_4 : i32
    %7 = arith.extui %6 : i1 to i32
    %c0_i32_5 = arith.constant 0 : i32
    %8 = arith.cmpi ne, %7, %c0_i32_5 : i32
    scf.if %8 {
      %c0_8 = arith.constant 0 : index
      %c0_9 = arith.constant 0 : index
      %12 = vector.load %arg7[%c0_8, %c0_9] : memref<8x128xf32, #tpu.memory_space<vmem>>, vector<8x128xf32>
      %13 = arith.addf %12, %2 : vector<8x128xf32>
      %c0_10 = arith.constant 0 : index
      %c0_11 = arith.constant 0 : index
      %14 = vector.load %arg7[%c0_10, %c0_11] : memref<8x128xf32, #tpu.memory_space<vmem>>, vector<8x128xf32>
      tpu.vector_store %arg7[%c0_10, %c0_11], %13 {strides = array<i32>} : memref<8x128xf32, #tpu.memory_space<vmem>>, vector<8x128xf32>,
    } else {
    }
    %c0_i32_6 = arith.constant 0 : i32
    %9 = arith.cmpi eq, %arg2, %c0_i32_6 : i32
    %10 = arith.extui %9 : i1 to i32
    %c0_i32_7 = arith.constant 0 : i32
    %11 = arith.cmpi ne, %10, %c0_i32_7 : i32
    scf.if %11 {
      %c0_8 = arith.constant 0 : index
      %c0_9 = arith.constant 0 : index
      %12 = vector.load %arg7[%c0_8, %c0_9] : memref<8x128xf32, #tpu.memory_space<vmem>>, vector<8x128xf32>
      %c0_10 = arith.constant 0 : index
      %c0_11 = arith.constant 0 : index
      %13 = vector.load %arg5[%c0_10, %c0_11] : memref<1x128xf32, #tpu.memory_space<vmem>>, vector<1x128xf32>
      %14 = vector.broadcast %13 : vector<1x128xf32> to vector<8x128xf32>
      %15 = arith.addf %12, %14 : vector<8x128xf32>
      %cst_12 = arith.constant 0.000000e+00 : f32
      %16 = vector.broadcast %cst_12 : f32 to vector<8x128xf32>
      %17 = arith.maximumf %15, %16 : vector<8x128xf32>
      %c0_13 = arith.constant 0 : index
      %c0_14 = arith.constant 0 : index
      %18 = vector.load %arg6[%c0_13, %c0_14] : memref<8x128xf32, #tpu.memory_space<vmem>>, vector<8x128xf32>
      tpu.vector_store %arg6[%c0_13, %c0_14], %17 {strides = array<i32>} : memref<8x128xf32, #tpu.memory_space<vmem>>, vector<8x128xf32>,
    } else {
    }
    return
  }
  func.func @transform_0(%arg0: i32, %arg1: i32, %arg2: i32) -> (i32, i32) {
    %c0_i32 = arith.constant 0 : i32
    return %arg0, %arg2 : i32, i32
  }
  func.func @transform_1(%arg0: i32, %arg1: i32, %arg2: i32) -> (i32, i32) {
    %c0_i32 = arith.constant 0 : i32
    return %arg2, %arg1 : i32, i32
  }
  func.func @transform_2(%arg0: i32, %arg1: i32, %arg2: i32) -> (i32, i32) {
    %c0_i32 = arith.constant 0 : i32
    %c0_i32_0 = arith.constant 0 : i32
    return %c0_i32, %arg1 : i32, i32
  }
  func.func @transform_3(%arg0: i32, %arg1: i32, %arg2: i32) -> (i32, i32) {
    %c0_i32 = arith.constant 0 : i32
    return %arg0, %arg1 : i32, i32
  }
}

</mosaic_0001>

<bundles_post_ra>
// kernel: tpu_custom_call.1
= control target key start
LH: loop header
LB: loop body
LE: loop exit
PB: predicated region body
PF: predicated region fallthrough
CT: control target
= control target key end

     0   :  { %8 = vsyncpa [#allocation4], 0  ;;  %s325_s0 = inlined_call_operand.hbm [shape: bf16[8,128], index: 0, kind: input, shape index: {}]   ;;  %s326_s1 = inlined_call_operand.hbm [shape: bf16[128,128], index: 1, kind: input, shape index: {}]   ;;  %s327_s2 = inlined_call_operand.vmem [shape: f32[1,128], index: 2, kind: input, shape index: {}]   ;;  %s328_s3 = inlined_call_operand.hbm [shape: f32[8,128], index: 3, kind: output, shape index: {}]  }
   0x1   :  { %9 = vsyncpa [#allocation7], 0 }
   0x2   :  { %10 = vsyncpa [#allocation5], 0  ;;  %s16_s14 = sshll.u32 %s325_s0, 4  ;;  %s288_s15 = smov [#allocation3]   ;;  %s17_s14 = int_to_ptr.hbm [resolvable:$true] %s16_s14 }
   0x3   :  { %s18_s16 = sshll.u32 %s288_s15, 4  ;;  %s26_s19 = sshll.u32 %s326_s1, 4  ;;  %s19_s16 = int_to_ptr.vmem [resolvable:$true] %s18_s16  ;;  %s27_s19 = int_to_ptr.hbm [resolvable:$true] %s26_s19 }
   0x4   :  { %21 = dma.hbm_to_vmem [thread:$0]  %s17_s14, 64, %s19_s16, [#allocation4]  }
   0x5   :  { %s289_s20 = smov [#allocation6]   ;;  %s290_s22 = smov 64  }
   0x6   :  { %s28_s21 = sshll.u32 %s289_s20, 4  ;;  %s291_s23 = smov 4   ;;  %s29_s21 = int_to_ptr.vmem [resolvable:$true] %s28_s21 }
   0x7   :  { %34 = dma.hbm_to_vmem [thread:$0]  %s27_s19, 1024, %s29_s21, [#allocation7], %s290_s22, %s290_s22, %s291_s23  }
   0x8   :  { %282 = dma.done.wait [#allocation4], 64  }
   0x9   :  { %283 = vsyncadd [#allocation4], 4294967232 }
   0xa   :  { %284 = dma.done.wait [#allocation7], 1024  }
   0xb   :  { %285 = vsyncadd [#allocation7], 4294966272  ;;  %v203_v0 = vld [vmem:[#allocation6 + $0x38] sm:$0xff]  ;;  %v202_v1 = vld [vmem:[#allocation6 + $0x30] sm:$0xff]  ;;  %s292_s24 = smov [#allocation8]   ;;  %s153_s28 = sshll.u32 %s328_s3, 4  ;;  %s154_s28 = int_to_ptr.hbm [resolvable:$true] %s153_s28 }
   0xc   :  { %110 = vmatpush.bf16.msra.mxu0 %v203_v0  ;;  %v201_v2 = vld [vmem:[#allocation6 + $0x28] sm:$0xff]  ;;  %v200_v3 = vld [vmem:[#allocation6 + $0x20] sm:$0xff]  ;;  %v199_v4 = vld [vmem:[#allocation6 + $0x18] sm:$0xff]  ;;  %s151_s25 = sshll.u32 %s292_s24, 4  ;;  %s152_s25 = int_to_ptr.vmem [resolvable:$true] %s151_s25 }
   0xd   :  { %v198_v5 = vld [vmem:[#allocation6 + $0x10] sm:$0xff]  ;;  %v197_v6 = vld [vmem:[#allocation6 + $0x8] sm:$0xff]  ;;  %v196_v7 = vld [vmem:[#allocation6] sm:$0xff] }
   0xe   :  { %v45_v8 = vld [vmem:[#allocation3] sm:$0xf] }
   0xf   :  { %v209_v9 = vld [vmem:[%s327_s2] ss:$0 sm:$0xff] }
  0x10   :  { %111 = vmatpush.bf16.msra.mxu0 %v202_v1 }
  0x14   :  { %112 = vmatpush.bf16.msra.mxu0 %v201_v2 }
  0x18   :  { %113 = vmatpush.bf16.msra.mxu0 %v200_v3 }
  0x1c   :  { %114 = vmatpush.bf16.msra.mxu0 %v199_v4 }
  0x20   :  { %115 = vmatpush.bf16.msra.mxu0 %v198_v5 }
  0x24   :  { %116 = vmatpush.bf16.msra.mxu0 %v197_v6 }
  0x28   :  { %117 = vmatpush.bf16.msra.mxu0 %v196_v7 }
  0x2b   :  { %118 = vmatmul.bf16.vlgmr.msra.gmra.mxu0 %v45_v8 }
  0xa8   :  { %v119_v10 = vpop.f32.mrf.mxu0 }
  0xa9   :  { %v143_v11 = vadd.f32 %v209_v9, %v119_v10 }
  0xab   :  { %v144_v12 = vmax.f32 %v143_v11, 0.0 }
  0xad   :  { %145 = vst [vmem:[#allocation8] sm:$0xff] %v144_v12 }
  0xae   :  { %156 = dma.vmem_to_hbm [thread:$0]  %s152_s25, 128, %s154_s28, [#allocation5]  }
  0xb0   :  { %v121_v13 = vpop.f32.mrf.mxu0 }
  0xb1   :  { %286 = dma.done.wait [#allocation5], 128  }
  0xb2   :  { %287 = vsyncadd [#allocation5], 4294967168 }
  0xb3   :  { %161 = vsyncpa [#allocation4], 1 }
  0xb4   :  { %162 = vsyncpa [#allocation7], 1 }
  0xb5   :  { %163 = vsyncpa [#allocation5], 1 }

</bundles_post_ra>
